<compile_context>
chip_gen: v7x
topology: tpu7x:2x2x1
jax: 0.10.0
libtpu: 0.0.40
codegen_flags: <defaults>
</compile_context>

<pallas_src>
import functools

import jax
import jax.numpy as jnp
from jax.experimental import pallas as pl
from jax.experimental.pallas import tpu as pltpu


def qnetwork_kernel(s_ref, a_ref, w1_ref, b1_ref,
                    w2s_ref, w2a_ref, b2_ref,
                    w3t_ref, b3_ref, o_ref, *, mm_dtype):
    # fc1 + ReLU  (bf16 MXU matmul, f32 accumulate, f32 epilogue)
    h1 = jnp.dot(s_ref[...], w1_ref[...], preferred_element_type=jnp.float32)
    h1 = jnp.maximum(h1 + b1_ref[...], 0.0)

    # fc2 over concat(h1, action) + ReLU  (exact split-matmul identity)
    h2 = (jnp.dot(h1.astype(mm_dtype), w2s_ref[...],
                  preferred_element_type=jnp.float32)
          + jnp.dot(a_ref[...], w2a_ref[...],
                    preferred_element_type=jnp.float32)
          + b2_ref[...])
    h2 = jnp.maximum(h2, 0.0)

    # fc3 -> scalar per row: VPU multiply + XLU lane reduction (no N=1 MXU pass)
    out = jnp.sum(h2 * w3t_ref[...], axis=-1, keepdims=True) + b3_ref[0, 0]
    o_ref[...] = out.astype(o_ref.dtype)


def _round_up(x, m):
    return ((x + m - 1) // m) * m


def qnetwork_forward(state, action, params, *, tile_b=256, use_bf16=True):
    """state: [B, S], action: [B, A] -> [B, 1] f32."""
    state = state.astype(jnp.float32)
    action = action.astype(jnp.float32)   # mirrors action.type(torch.FloatTensor)
    B, S = state.shape
    A = action.shape[1]
    w1, b1, w2s, w2a, b2, w3t, b3 = params
    H = w1.shape[1]                       # hidden padded to 128

    # Batch tile: multiple of 16 so both f32 (8-sublane) and bf16 (16-sublane)
    # tiling constraints hold; pad the batch up to a whole number of tiles.
    tile_b = _round_up(max(1, min(tile_b, B)), 16)
    b_pad = _round_up(B, tile_b)
    if b_pad != B:
        state = jnp.pad(state, ((0, b_pad - B), (0, 0)))
        action = jnp.pad(action, ((0, b_pad - B), (0, 0)))

    mm_dtype = jnp.bfloat16 if use_bf16 else jnp.float32
    s_in = state.astype(mm_dtype)
    a_in = action.astype(mm_dtype)
    w1_in = w1.astype(mm_dtype)
    w2s_in = w2s.astype(mm_dtype)
    w2a_in = w2a.astype(mm_dtype)

    grid = (b_pad // tile_b,)

    def batch_spec(f):
        return pl.BlockSpec((tile_b, f), lambda i: (i, 0))

    def pinned(shape):                    # weight resident across all grid steps
        return pl.BlockSpec(shape, lambda i: (0, 0))

    out = pl.pallas_call(
        functools.partial(qnetwork_kernel, mm_dtype=mm_dtype),
        out_shape=jax.ShapeDtypeStruct((b_pad, 1), jnp.float32),
        grid=grid,
        in_specs=[
            batch_spec(S),                                        # state
            batch_spec(A),                                        # action
            pinned((S, H)),                                       # w1
            pinned((1, H)),                                       # b1
            pinned((H, H)),                                       # w2 (state rows)
            pinned((A, H)),                                       # w2 (action rows)
            pinned((1, H)),                                       # b2
            pinned((1, H)),                                       # w3^T row
            pl.BlockSpec(memory_space=pltpu.MemorySpace.SMEM),    # b3 scalar
        ],
        out_specs=pl.BlockSpec((tile_b, 1), lambda i: (i, 0)),
        compiler_params=pltpu.CompilerParams(
            dimension_semantics=("parallel",),   # shard batch grid across TCs (v7x)
        ),
    )(s_in, a_in, w1_in, b1, w2s_in, w2a_in, b2, w3t, b3)

    return out[:B] if b_pad != B else out


def init_params(key, state_size, action_size, hidden=100):
    """PyTorch nn.Linear-style init: U(-1/sqrt(fan_in), 1/sqrt(fan_in)).
    Weights are stored as [in_features, out_features] (i.e. already W^T)."""
    ks = jax.random.split(key, 6)

    def lin(kw, kb, fan_in, fan_out):
        bound = 1.0 / float(fan_in) ** 0.5
        w = jax.random.uniform(kw, (fan_in, fan_out), jnp.float32, -bound, bound)
        b = jax.random.uniform(kb, (1, fan_out), jnp.float32, -bound, bound)
        return w, b

    w1, b1 = lin(ks[0], ks[1], state_size, hidden)               # fc1
    w2, b2 = lin(ks[2], ks[3], hidden + action_size, hidden)     # fc2
    w3, b3 = lin(ks[4], ks[5], hidden, 1)                        # fc3
    return (w1, b1, w2, b2, w3, b3)


def prepare_params(raw_params, hidden_pad=128):
    """Pad hidden -> hidden_pad (lane-dense 128), split fc2 along its input dim
    (concat identity), transpose fc3 to a row vector. Padding is zero so the
    padded lanes stay exactly 0 through ReLU."""
    w1, b1, w2, b2, w3, b3 = raw_params
    hidden = w1.shape[1]
    pad = hidden_pad - hidden
    w1p = jnp.pad(w1, ((0, 0), (0, pad)))
    b1p = jnp.pad(b1, ((0, 0), (0, pad)))
    w2s = jnp.pad(w2[:hidden, :], ((0, pad), (0, pad)))
    w2a = jnp.pad(w2[hidden:, :], ((0, 0), (0, pad)))
    b2p = jnp.pad(b2, ((0, 0), (0, pad)))
    w3t = jnp.pad(w3.T, ((0, 0), (0, pad)))                      # [1, hidden_pad]
    b3s = b3.reshape(1, 1)
    return (w1p, b1p, w2s, w2a, b2p, w3t, b3s)


def reference_forward(state, action, raw_params, mm_dtype=jnp.bfloat16):
    """Plain-JAX mirror of QNetwork.forward (including the concat), with the
    same bf16 operand quantization the kernel applies for its MXU matmuls."""
    w1, b1, w2, b2, w3, b3 = raw_params
    q = lambda x: x.astype(mm_dtype).astype(jnp.float32)
    s = q(state.astype(jnp.float32))
    a = q(action.astype(jnp.float32))
    h1 = jnp.maximum(jnp.dot(s, q(w1)) + b1, 0.0)
    cat = jnp.concatenate([q(h1), a], axis=1)
    h2 = jnp.maximum(jnp.dot(cat, q(w2)) + b2, 0.0)
    return jnp.dot(h2, w3) + b3


if __name__ == "__main__":
    batch = 8
    state_size = 16
    action_size = 4

    key = jax.random.PRNGKey(0)
    k_s, k_a, k_p, k_s2, k_a2 = jax.random.split(key, 5)

    state = jax.random.normal(k_s, (batch, state_size), jnp.float32)
    action = jax.random.normal(k_a, (batch, action_size), jnp.float32)

    raw = init_params(k_p, state_size, action_size, hidden=100)
    params = prepare_params(raw, hidden_pad=128)

    out = jax.block_until_ready(qnetwork_forward(state, action, params))
    ref = reference_forward(state, action, raw)
    assert out.shape == (batch, 1), out.shape
    assert jnp.allclose(out, ref, atol=2e-3, rtol=2e-3), (out, ref)

    # Larger ragged batch: exercises batch padding and a multi-step parallel grid.
    big_b = 100
    state2 = jax.random.normal(k_s2, (big_b, state_size), jnp.float32)
    action2 = jax.random.normal(k_a2, (big_b, action_size), jnp.float32)
    out2 = jax.block_until_ready(
        qnetwork_forward(state2, action2, params, tile_b=32))
    ref2 = reference_forward(state2, action2, raw)
    assert out2.shape == (big_b, 1), out2.shape
    assert jnp.allclose(out2, ref2, atol=2e-3, rtol=2e-3), (out2, ref2)

    print("KERNEL_OK")
</pallas_src>

<mosaic_0001>
module attributes {stable_mosaic.version = 11 : i64} {
  func.func @qnetwork_kernel(%arg0: i32, %arg1: memref<16x16xbf16, #tpu.memory_space<vmem>>, %arg2: memref<16x4xbf16, #tpu.memory_space<vmem>>, %arg3: memref<16x128xbf16, #tpu.memory_space<vmem>>, %arg4: memref<1x128xf32, #tpu.memory_space<vmem>>, %arg5: memref<128x128xbf16, #tpu.memory_space<vmem>>, %arg6: memref<4x128xbf16, #tpu.memory_space<vmem>>, %arg7: memref<1x128xf32, #tpu.memory_space<vmem>>, %arg8: memref<1x128xf32, #tpu.memory_space<vmem>>, %arg9: memref<1x1xf32, #tpu.memory_space<smem>>, %arg10: memref<16x1xf32, #tpu.memory_space<vmem>>) attributes {dimension_semantics = [#tpu.dimension_semantics<parallel>], iteration_bounds = array<i64: 1>, scalar_prefetch = 0 : i64, scratch_operands = 0 : i64, tpu.core_type = #tpu.core_type<tc>, window_params = [{transform_indices = @transform_0, window_bounds = array<i64: 16, 16>}, {transform_indices = @transform_1, window_bounds = array<i64: 16, 4>}, {pipeline_mode = #tpu.pipeline_mode<synchronous>, transform_indices = @transform_2, window_bounds = array<i64: 16, 128>}, {pipeline_mode = #tpu.pipeline_mode<synchronous>, transform_indices = @transform_3, window_bounds = array<i64: 1, 128>}, {pipeline_mode = #tpu.pipeline_mode<synchronous>, transform_indices = @transform_4, window_bounds = array<i64: 128, 128>}, {pipeline_mode = #tpu.pipeline_mode<synchronous>, transform_indices = @transform_5, window_bounds = array<i64: 4, 128>}, {pipeline_mode = #tpu.pipeline_mode<synchronous>, transform_indices = @transform_6, window_bounds = array<i64: 1, 128>}, {pipeline_mode = #tpu.pipeline_mode<synchronous>, transform_indices = @transform_7, window_bounds = array<i64: 1, 128>}, {transform_indices = @transform_8, window_bounds = array<i64: 1, 1>}, {transform_indices = @transform_9, window_bounds = array<i64: 16, 1>}]} {
    %c0 = arith.constant 0 : index
    %c0_0 = arith.constant 0 : index
    %0 = vector.load %arg1[%c0, %c0_0] : memref<16x16xbf16, #tpu.memory_space<vmem>>, vector<16x16xbf16>
    %c0_1 = arith.constant 0 : index
    %c0_2 = arith.constant 0 : index
    %1 = vector.load %arg3[%c0_1, %c0_2] : memref<16x128xbf16, #tpu.memory_space<vmem>>, vector<16x128xbf16>
    %cst = arith.constant dense<0.000000e+00> : vector<16x128xf32>
    %2 = tpu.matmul %0, %1, %cst {dimension_numbers = #tpu.dot_dimension_numbers<[1], [0], [0], [1], [0, 0, 1, 1], [], []>} : vector<16x16xbf16>, vector<16x128xbf16>, vector<16x128xf32> -> vector<16x128xf32>
    %c0_3 = arith.constant 0 : index
    %c0_4 = arith.constant 0 : index
    %3 = vector.load %arg4[%c0_3, %c0_4] : memref<1x128xf32, #tpu.memory_space<vmem>>, vector<1x128xf32>
    %4 = vector.broadcast %3 : vector<1x128xf32> to vector<16x128xf32>
    %5 = arith.addf %2, %4 : vector<16x128xf32>
    %cst_5 = arith.constant 0.000000e+00 : f32
    %6 = vector.broadcast %cst_5 : f32 to vector<16x128xf32>
    %7 = arith.maximumf %5, %6 : vector<16x128xf32>
    %8 = arith.truncf %7 : vector<16x128xf32> to vector<16x128xbf16>
    %c0_6 = arith.constant 0 : index
    %c0_7 = arith.constant 0 : index
    %9 = vector.load %arg5[%c0_6, %c0_7] : memref<128x128xbf16, #tpu.memory_space<vmem>>, vector<128x128xbf16>
    %cst_8 = arith.constant dense<0.000000e+00> : vector<16x128xf32>
    %10 = tpu.matmul %8, %9, %cst_8 {dimension_numbers = #tpu.dot_dimension_numbers<[1], [0], [0], [1], [0, 0, 1, 1], [], []>} : vector<16x128xbf16>, vector<128x128xbf16>, vector<16x128xf32> -> vector<16x128xf32>
    %c0_9 = arith.constant 0 : index
    %c0_10 = arith.constant 0 : index
    %11 = vector.load %arg2[%c0_9, %c0_10] : memref<16x4xbf16, #tpu.memory_space<vmem>>, vector<16x4xbf16>
    %c0_11 = arith.constant 0 : index
    %c0_12 = arith.constant 0 : index
    %12 = vector.load %arg6[%c0_11, %c0_12] : memref<4x128xbf16, #tpu.memory_space<vmem>>, vector<4x128xbf16>
    %cst_13 = arith.constant dense<0.000000e+00> : vector<16x128xf32>
    %13 = tpu.matmul %11, %12, %cst_13 {dimension_numbers = #tpu.dot_dimension_numbers<[1], [0], [0], [1], [0, 0, 1, 1], [], []>} : vector<16x4xbf16>, vector<4x128xbf16>, vector<16x128xf32> -> vector<16x128xf32>
    %14 = arith.addf %10, %13 : vector<16x128xf32>
    %c0_14 = arith.constant 0 : index
    %c0_15 = arith.constant 0 : index
    %15 = vector.load %arg7[%c0_14, %c0_15] : memref<1x128xf32, #tpu.memory_space<vmem>>, vector<1x128xf32>
    %16 = vector.broadcast %15 : vector<1x128xf32> to vector<16x128xf32>
    %17 = arith.addf %14, %16 : vector<16x128xf32>
    %cst_16 = arith.constant 0.000000e+00 : f32
    %18 = vector.broadcast %cst_16 : f32 to vector<16x128xf32>
    %19 = arith.maximumf %17, %18 : vector<16x128xf32>
    %c0_17 = arith.constant 0 : index
    %c0_18 = arith.constant 0 : index
    %20 = vector.load %arg8[%c0_17, %c0_18] : memref<1x128xf32, #tpu.memory_space<vmem>>, vector<1x128xf32>
    %21 = vector.broadcast %20 : vector<1x128xf32> to vector<16x128xf32>
    %22 = arith.mulf %19, %21 : vector<16x128xf32>
    %cst_19 = arith.constant dense<0.000000e+00> : vector<16xf32>
    %23 = vector.multi_reduction <add>, %22, %cst_19 [1] : vector<16x128xf32> to vector<16xf32>
    %24 = vector.shape_cast %23 : vector<16xf32> to vector<16x1xf32>
    %c0_20 = arith.constant 0 : index
    %c0_21 = arith.constant 0 : index
    %25 = memref.load %arg9[%c0_20, %c0_21] : memref<1x1xf32, #tpu.memory_space<smem>>
    %26 = vector.broadcast %25 : f32 to vector<16x1xf32>
    %27 = arith.addf %24, %26 : vector<16x1xf32>
    %c0_22 = arith.constant 0 : index
    %c0_23 = arith.constant 0 : index
    %28 = vector.load %arg10[%c0_22, %c0_23] : memref<16x1xf32, #tpu.memory_space<vmem>>, vector<16x1xf32>
    tpu.vector_store %arg10[%c0_22, %c0_23], %27 {strides = array<i32>} : memref<16x1xf32, #tpu.memory_space<vmem>>, vector<16x1xf32>,
    return
  }
  func.func @transform_0(%arg0: i32) -> (i32, i32) {
    %c0_i32 = arith.constant 0 : i32
    %c0_i32_0 = arith.constant 0 : i32
    return %arg0, %c0_i32 : i32, i32
  }
  func.func @transform_1(%arg0: i32) -> (i32, i32) {
    %c0_i32 = arith.constant 0 : i32
    %c0_i32_0 = arith.constant 0 : i32
    return %arg0, %c0_i32 : i32, i32
  }
  func.func @transform_2(%arg0: i32) -> (i32, i32) {
    %c0_i32 = arith.constant 0 : i32
    %c0_i32_0 = arith.constant 0 : i32
    %c0_i32_1 = arith.constant 0 : i32
    return %c0_i32, %c0_i32_0 : i32, i32
  }
  func.func @transform_3(%arg0: i32) -> (i32, i32) {
    %c0_i32 = arith.constant 0 : i32
    %c0_i32_0 = arith.constant 0 : i32
    %c0_i32_1 = arith.constant 0 : i32
    return %c0_i32, %c0_i32_0 : i32, i32
  }
  func.func @transform_4(%arg0: i32) -> (i32, i32) {
    %c0_i32 = arith.constant 0 : i32
    %c0_i32_0 = arith.constant 0 : i32
    %c0_i32_1 = arith.constant 0 : i32
    return %c0_i32, %c0_i32_0 : i32, i32
  }
  func.func @transform_5(%arg0: i32) -> (i32, i32) {
    %c0_i32 = arith.constant 0 : i32
    %c0_i32_0 = arith.constant 0 : i32
    %c0_i32_1 = arith.constant 0 : i32
    return %c0_i32, %c0_i32_0 : i32, i32
  }
  func.func @transform_6(%arg0: i32) -> (i32, i32) {
    %c0_i32 = arith.constant 0 : i32
    %c0_i32_0 = arith.constant 0 : i32
    %c0_i32_1 = arith.constant 0 : i32
    return %c0_i32, %c0_i32_0 : i32, i32
  }
  func.func @transform_7(%arg0: i32) -> (i32, i32) {
    %c0_i32 = arith.constant 0 : i32
    %c0_i32_0 = arith.constant 0 : i32
    %c0_i32_1 = arith.constant 0 : i32
    return %c0_i32, %c0_i32_0 : i32, i32
  }
  func.func @transform_8(%arg0: i32) -> (i32, i32) {
    %c0_i32 = arith.constant 0 : i32
    %c0_i32_0 = arith.constant 0 : i32
    %c0_i32_1 = arith.constant 0 : i32
    return %c0_i32, %c0_i32_0 : i32, i32
  }
  func.func @transform_9(%arg0: i32) -> (i32, i32) {
    %c0_i32 = arith.constant 0 : i32
    %c0_i32_0 = arith.constant 0 : i32
    return %arg0, %c0_i32 : i32, i32
  }
}

</mosaic_0001>

<bundles_post_ra>
// kernel: tpu_custom_call.1
= control target key start
LH: loop header
LB: loop body
LE: loop exit
PB: predicated region body
PF: predicated region fallthrough
CT: control target
= control target key end

     0   :  { %15 = vsyncpa [#allocation4], 0  ;;  %s417_s30 = smov [#allocation3]   ;;  %s514_s0 = inlined_call_operand.vmem [shape: bf16[16,16], index: 0, kind: input, shape index: {}]   ;;  %s515_s1 = inlined_call_operand.vmem [shape: bf16[16,4], index: 1, kind: input, shape index: {}]   ;;  %s516_s2 = inlined_call_operand.vmem [shape: bf16[16,128], index: 2, kind: input, shape index: {}]   ;;  %s517_s3 = inlined_call_operand.vmem [shape: f32[1,128], index: 3, kind: input, shape index: {}]   ;;  %s518_s4 = inlined_call_operand.hbm [shape: bf16[128,128], index: 4, kind: input, shape index: {}]   ;;  %s519_s5 = inlined_call_operand.vmem [shape: bf16[4,128], index: 5, kind: input, shape index: {}]   ;;  %s520_s6 = inlined_call_operand.vmem [shape: f32[1,128], index: 6, kind: input, shape index: {}]   ;;  %s521_s7 = inlined_call_operand.vmem [shape: f32[1,128], index: 7, kind: input, shape index: {}]   ;;  %s522_s8 = inlined_call_operand.<no memory space> [shape: f32[1,1], index: 8, kind: input, shape index: {}]   ;;  %s523_s9 = inlined_call_operand.vmem [shape: f32[16,1], index: 9, kind: output, shape index: {}]  }
   0x1   :  { %s29_s10 = sshll.u32 %s417_s30, 4  ;;  %s393_s13 = scalar_lea.hbm %s518_s4, 1024  ;;  %s30_s10 = int_to_ptr.vmem [resolvable:$true] %s29_s10 }
   0x2   :  { %p394_p0 = scmp.ne.s32.totalorder %s518_s4, %s393_s13  ;;  %p397_p1 = scmp.lt.u32.totalorder %s393_s13, %s518_s4 }
   0x4   :  { %p399_p2 = pnand %p397_p1, %p394_p0 }
   0x6   :  { %402 = shalt.err (!%p399_p2)
}
   0x7   :  { %s403_s18 = scalar_lea.vmem %s30_s10, 1024  ;;  %p408_p4 = scmp.lt.s32.totalorder %s30_s10, %s30_s10 }
   0x8   :  { %p404_p3 = scmp.ne.s32.totalorder %s30_s10, %s403_s18  ;;  %p409_p5 = scmp.lt.s32.totalorder %s403_s18, %s403_s18 }
   0xa   :  { %p410_p6 = por %p409_p5, %p408_p4 }
   0xc   :  { %p411_p7 = pnand %p410_p6, %p404_p3 }
   0xe   :  { %414 = shalt.err (!%p411_p7)
}
   0xf   :  { %s418_s19 = smov 64   ;;  %s419_s20 = smov 4  }
  0x10   :  { %35 = dma.hbm_to_vmem [thread:$0]  %s518_s4, 1024, %s30_s10, [#allocation4], %s418_s19, %s418_s19, %s419_s20  }
  0x11   :  { %415 = dma.done.wait [#allocation4], 1024  }
  0x12   :  { %416 = vsyncadd [#allocation4], 4294966272  ;;  %v420_v0 = vmov 0.0   ;;  %vm421_vm0 = vmmov 0   ;;  %v382_v1 = vld [vmem:[%s516_s2] sm:$0xff]   ;;  %vm70_vm1 = vcmask 130048   ;;  %v305_v42 = vstv %s522_s8 }
  0x13   :  { %345 = vmatprep.subr.bf16.mxu1 %v420_v0  ;;  %347 = vmatprep.mubr.msk.bf16.mxu1 %vm421_vm0, %v420_v0  ;;  %v383_v2 = vld [vmem:[%s514_s0] sm:$0xff]   ;;  %v385_v4 = vld [vmem:[#allocation3 + $0x8] sm:$0xff]   ;;  %v386_v5 = vld [vmem:[#allocation3 + $0x10] sm:$0xff]   ;;  %vm146_vm2 = vcmask 1041408   ;;  %vm142_vm3 = vcmask 31744   ;;  %vm308_vm4 = vcmask 7168  }
  0x14   :  { %357 = vmatprep.subr.bf16.mxu0 %v420_v0  ;;  %373 = vmatprep.mubr.msk.bf16.mxu0 %vm421_vm0, %v420_v0  ;;  %v384_v3 = vld [vmem:[#allocation3] sm:$0xff]   ;;  %v387_v6 = vld [vmem:[#allocation3 + $0x18] sm:$0xff]   ;;  %v389_v8 = vld [vmem:[#allocation3 + $0x28] sm:$0xff]  }
  0x15   :  { %346 = vmatpush3.bf16.msra.mxu1 %v382_v1  ;;  %358 = vmatpush3.bf16.msra.mxu0 %v384_v3  ;;  %v388_v7 = vld [vmem:[#allocation3 + $0x20] sm:$0xff]   ;;  %v390_v9 = vld [vmem:[#allocation3 + $0x30] sm:$0xff]   ;;  %v392_v13 = vld [vmem:[#allocation3 + $0x38] sm:$0xff]  }
  0x16   :  { %351 = vmatprep.subr.bf16.mxu1 %v420_v0  ;;  %359 = vmatprep.subr.bf16.mxu0 %v420_v0  ;;  %v136_v10 = vld [vmem:[%s519_s5] sm:$0x3] }
  0x17   :  { %v148_v11 = vsel %vm146_vm2, %v136_v10, 0  ;;  %v391_v12 = vld [vmem:[%s515_s1] sm:$0xff]  }
  0x18   :  { %348 = vmatmul.mubr.msk.bf16.vlgmr.msra.gmra.mrb[0].mxu1 %vm70_vm1, %v383_v2  ;;  %v316_v14 = vld [vmem:[%s517_s3] ss:$0 sm:$0xff] }
  0x19   :  { %353 = vmatprep.mubr.msk.bf16.mxu1 %vm421_vm0, %v420_v0  ;;  %360 = vmatpush3.bf16.msra.mxu0 %v385_v4  ;;  %v330_v29 = vld [vmem:[%s520_s6] ss:$0 sm:$0xff] }
  0x1a   :  { %361 = vmatprep.subr.bf16.mxu0 %v420_v0  ;;  %352 = vmatpush3.bf16.msra.mxu1 %v148_v11  ;;  %v331_v36 = vld [vmem:[%s521_s7] ss:$0 sm:$0xff] }
  0x1d   :  { %362 = vmatpush3.bf16.msra.mxu0 %v386_v5 }
  0x1e   :  { %363 = vmatprep.subr.bf16.mxu0 %v420_v0 }
  0x20   :  { %354 = vmatmul.mubr.msk.bf16.vlgmr.msra.gmra.mrb[4].mxu1 %vm142_vm3, %v391_v12 }
  0x21   :  { %364 = vmatpush3.bf16.msra.mxu0 %v387_v6 }
  0x22   :  { %365 = vmatprep.subr.bf16.mxu0 %v420_v0 }
  0x25   :  { %366 = vmatpush3.bf16.msra.mxu0 %v388_v7 }
  0x26   :  { %367 = vmatprep.subr.bf16.mxu0 %v420_v0 }
  0x29   :  { %368 = vmatpush3.bf16.msra.mxu0 %v389_v8 }
  0x2a   :  { %369 = vmatprep.subr.bf16.mxu0 %v420_v0 }
  0x2d   :  { %370 = vmatpush3.bf16.msra.mxu0 %v390_v9 }
  0x2e   :  { %371 = vmatprep.subr.bf16.mxu0 %v420_v0 }
  0x31   :  { %372 = vmatpush3.bf16.msra.mxu0 %v392_v13 }
  0xeb   :  { %v108_v15 = vpop.f32.mrb[0].mxu1 }
  0xec   :  { %v109_v16 = vadd.f32 %v316_v14, %v108_v15  ;;  %v349_v17 = vpop.f32.mrb[1].mxu1 }
  0xed   :  { %v111_v18 = vpop.f32.mrb[2].mxu1 }
  0xee   :  { %v112_v19 = vadd.f32 %v316_v14, %v111_v18  ;;  %v350_v20 = vpop.f32.mrb[3].mxu1  ;;  %v115_v21 = vmax.f32 %v109_v16, 0.0 }
  0xf0   :  { %v116_v22 = vmax.f32 %v112_v19, 0.0 }
  0xf2   :  { %v117_v23 = vpack.c.bf16 %v116_v22, %v115_v21 }
  0xf3   :  { %v184_v24 = vpop.f32.mrb[4].mxu1 }
  0xf4   :  { %374 = vmatmul.mubr.bf16.vlgmr.msra.gmra.mrb[0].mxu0 %v117_v23  ;;  %v355_v25 = vpop.f32.mrb[5].mxu1 }
  0xf5   :  { %v187_v26 = vpop.f32.mrb[6].mxu1 }
  0xf6   :  { %v356_v27 = vpop.f32.mrb[7].mxu1 }
 0x1c7   :  { %v273_v28 = vpop.f32.mrb[0].mxu0 }
 0x1c8   :  { %v274_v30 = vadd.f32 %v273_v28, %v184_v24  ;;  %v375_v31 = vpop.f32.mrb[1].mxu0 }
 0x1c9   :  { %v276_v32 = vpop.f32.mrb[2].mxu0 }
 0x1ca   :  { %v277_v33 = vadd.f32 %v276_v32, %v187_v26  ;;  %v376_v34 = vpop.f32.mrb[3].mxu0  ;;  %v287_v35 = vadd.f32 %v330_v29, %v274_v30 }
 0x1cc   :  { %v288_v37 = vadd.f32 %v330_v29, %v277_v33  ;;  %v289_v38 = vmax.f32 %v287_v35, 0.0 }
 0x1ce   :  { %v290_v39 = vmax.f32 %v288_v37, 0.0  ;;  %v298_v40 = vmul.f32 %v331_v36, %v289_v38 }
 0x1d0   :  { %300 = vadd.xlane.f32.xlu0 %v298_v40  ;;  %v299_v41 = vmul.f32 %v331_v36, %v290_v39 }
 0x1d4   :  { %302 = vadd.xlane.f32.xlu0 %v299_v41 }
 0x25d   :  { %v301_v43 = vpop.xlane.xlu0 %300 }
 0x25e   :  { %v306_v44 = vadd.f32 %v305_v42, %v301_v43 }
 0x260   :  { %309 = vst.msk [vmem:[%s523_s9] sm:$0xff] %vm308_vm4, %v306_v44 }
 0x261   :  { %v303_v45 = vpop.xlane.xlu0 %302 }
 0x262   :  { %v307_v46 = vadd.f32 %v305_v42, %v303_v45 }
 0x264   :  { %310 = vst.msk [vmem:[%s523_s9 + $0x8] sm:$0xff] %vm308_vm4, %v307_v46 }
 0x265   :  { %315 = vsyncpa [#allocation4], 1 }

</bundles_post_ra>
